<compile_context>
chip_gen: v7x
topology: tpu7x:2x2x1
jax: 0.10.0
libtpu: 0.0.40
codegen_flags: <defaults>
</compile_context>

<pallas_src>
import functools
import math

import jax
import jax.numpy as jnp
from jax.experimental import pallas as pl
from jax.experimental.pallas import tpu as pltpu

_SELU_ALPHA = 1.6732632423543772
_SELU_SCALE = 1.0507009873554805

_LANE = 128
_SUBLANE = 8


def _round_up(x: int, m: int) -> int:
    return (x + m - 1) // m * m


def _selu_f32(y):
    return _SELU_SCALE * jnp.where(y > 0, y, _SELU_ALPHA * (jnp.exp(y) - 1.0))


def _snn_fused_kernel(*refs, n_hidden: int):
    """refs = (x_ref, [w_i, b_i]*n_hidden, w_head, b_head, o_ref).

    x_ref: (TM, d_in_pad) bf16; w_i bf16, b_i f32 (1, d_pad); o_ref (TM, 128*k) f32.
    The layer loop is a static Python unroll; activations stay in vregs/VMEM.
    """
    x_ref = refs[0]
    o_ref = refs[-1]
    wb = refs[1:-1]

    x = x_ref[...]                      # bf16 (TM, d_in_pad)
    for i in range(n_hidden):
        w = wb[2 * i][...]              # bf16 (prev_pad, d_pad)
        b = wb[2 * i + 1][...]          # f32  (1, d_pad)
        y = jnp.dot(x, w, preferred_element_type=jnp.float32) + b
        y = _selu_f32(y)
        x = y.astype(jnp.bfloat16)      # feed MXU bf16 for the next layer

    w_h = wb[2 * n_hidden][...]
    b_h = wb[2 * n_hidden + 1][...]
    y = jnp.dot(x, w_h, preferred_element_type=jnp.float32) + b_h
    o_ref[...] = y.astype(o_ref.dtype)


def snn_forward_fused(x, hidden_ws, hidden_bs, head_w, head_b, *, tm: int):
    """x: (B_pad, d_in_pad) bf16, B_pad % tm == 0.  Returns (B_pad, d_head_pad) f32."""
    B, d_in_pad = x.shape
    d_head_pad = head_w.shape[1]
    n_hidden = len(hidden_ws)

    resident = lambda i: (0, 0)         # weights/biases stay put across batch tiles

    in_specs = [pl.BlockSpec((tm, d_in_pad), lambda i: (i, 0))]
    operands = [x]
    for w, b in zip(hidden_ws, hidden_bs):
        in_specs += [pl.BlockSpec(w.shape, resident), pl.BlockSpec(b.shape, resident)]
        operands += [w, b]
    in_specs += [pl.BlockSpec(head_w.shape, resident), pl.BlockSpec(head_b.shape, resident)]
    operands += [head_w, head_b]

    kernel = functools.partial(_snn_fused_kernel, n_hidden=n_hidden)

    all_ws = list(hidden_ws) + [head_w]
    flops = int(2 * B * sum(w.shape[0] * w.shape[1] for w in all_ws))
    transcendentals = int(B * sum(w.shape[1] for w in hidden_ws))
    bytes_accessed = int(
        x.size * 2
        + sum(w.size * 2 for w in all_ws)
        + sum(b.size * 4 for b in list(hidden_bs) + [head_b])
        + B * d_head_pad * 4
    )

    return pl.pallas_call(
        kernel,
        out_shape=jax.ShapeDtypeStruct((B, d_head_pad), jnp.float32),
        grid=(B // tm,),
        in_specs=in_specs,
        out_specs=pl.BlockSpec((tm, d_head_pad), lambda i: (i, 0)),
        compiler_params=pltpu.CompilerParams(
            dimension_semantics=("parallel",),          # shard batch tiles across TCs
            vmem_limit_bytes=32 * 1024 * 1024,          # safe on v5e/v6e/v7x scoped VMEM
        ),
        cost_estimate=pl.CostEstimate(
            flops=flops, transcendentals=transcendentals, bytes_accessed=bytes_accessed
        ),
    )(*operands)


class SNNPallas:
    """JAX/Pallas port of TabBench SNN (eval mode)."""

    # Batch tile: 512 reaches ~85% of HBM roofline on v6e; halve on v7x (64 MiB VMEM)
    # if widths get large.  For tiny batches we just use the (sublane-rounded) batch.
    MAX_TM = 512

    def __init__(self, *, d_in, d_layers, dropout, d_out, categories,
                 d_embedding, key):
        self.categories = categories
        self.dropout = dropout
        self.d_out = d_out
        keys = jax.random.split(key, 2 + 2 * (len(d_layers) + 1))
        kidx = 0

        if categories is not None:
            d_in += len(categories) * d_embedding
            # category_offsets = cumsum([0] + categories[:-1])
            self.category_offsets = jnp.cumsum(
                jnp.array([0] + list(categories[:-1]), dtype=jnp.int32))
            n_emb = sum(categories)
            # kaiming_uniform_(a=sqrt(5)) on (n_emb, d_embedding): fan_in = d_embedding
            bound = math.sqrt(6.0 / ((1.0 + 5.0) * d_embedding))
            self.category_embeddings = jax.random.uniform(
                keys[kidx], (n_emb, d_embedding), jnp.float32, -bound, bound)
            kidx += 1
        else:
            self.category_offsets = None
            self.category_embeddings = None

        # hidden layers: kaiming_normal_(fan_in, 'linear') -> std = 1/sqrt(fan_in), bias = 0
        # Weights stored (in, out) so the kernel hot path is a plain x @ W.
        self.weights = []
        self.biases = []
        prev = d_in
        for d in d_layers:
            std = 1.0 / math.sqrt(prev)
            w = std * jax.random.normal(keys[kidx], (prev, d), jnp.float32)
            kidx += 1
            self.weights.append(w)
            self.biases.append(jnp.zeros((d,), jnp.float32))
            prev = d

        std = 1.0 / math.sqrt(prev)
        self.head_w = std * jax.random.normal(keys[kidx], (prev, d_out), jnp.float32)
        self.head_b = jnp.zeros((d_out,), jnp.float32)

        # ---- pre-padded / pre-cast kernel parameters (hoisted out of the call path) ----
        self.d_in_raw = d_in
        self.d_in_pad = _round_up(d_in, _LANE)
        dims_pad = [_round_up(d, _LANE) for d in d_layers]
        self.d_head_pad = _round_up(d_out, _LANE)

        self.w_pad, self.b_pad = [], []
        prev_raw, prev_pad = d_in, self.d_in_pad
        for w, b, d, d_pad in zip(self.weights, self.biases, d_layers, dims_pad):
            wp = jnp.zeros((prev_pad, d_pad), jnp.float32).at[:prev_raw, :d].set(w)
            self.w_pad.append(wp.astype(jnp.bfloat16))
            self.b_pad.append(jnp.zeros((1, d_pad), jnp.float32).at[:, :d].set(b))
            prev_raw, prev_pad = d, d_pad
        hwp = jnp.zeros((prev_pad, self.d_head_pad), jnp.float32)
        hwp = hwp.at[:prev_raw, :d_out].set(self.head_w)
        self.head_w_pad = hwp.astype(jnp.bfloat16)
        self.head_b_pad = jnp.zeros((1, self.d_head_pad), jnp.float32).at[:, :d_out].set(self.head_b)

        # jit the whole forward so gather/concat/pad glue fuses with the kernel dispatch
        self._jit_forward = jax.jit(self._forward)

    # ------------------------------------------------------------------ forward
    def _forward(self, x_num, x_cat):
        parts = []
        if x_num is not None:
            parts.append(x_num.astype(jnp.float32))
        if x_cat is not None:
            idx = x_cat + self.category_offsets[None, :]            # (B, n_cat)
            emb = jnp.take(self.category_embeddings, idx, axis=0)    # (B, n_cat, d_emb)
            parts.append(emb.reshape(x_cat.shape[0], -1))
        x = jnp.concatenate(parts, axis=-1)                          # (B, d_in_raw)

        B = x.shape[0]
        # pad features to a lane-dense width
        x = jnp.pad(x, ((0, 0), (0, self.d_in_pad - x.shape[1])))
        # pick batch tile and pad the batch to a multiple of it
        tm = min(self.MAX_TM, _round_up(B, _SUBLANE))
        b_pad = _round_up(B, tm)
        if b_pad != B:
            x = jnp.pad(x, ((0, b_pad - B), (0, 0)))
        x = x.astype(jnp.bfloat16)

        y = snn_forward_fused(x, self.w_pad, self.b_pad,
                              self.head_w_pad, self.head_b_pad, tm=tm)
        y = y[:B, : self.d_out]
        if self.d_out == 1:
            y = y[:, 0]                                              # squeeze(-1)
        return y

    def __call__(self, x_num, x_cat):
        return self._jit_forward(x_num, x_cat)


def _reference(model, x_num, x_cat):
    """Pure-JAX f32 reference (unpadded weights) to sanity check the Pallas path."""
    idx = x_cat + model.category_offsets[None, :]
    emb = jnp.take(model.category_embeddings, idx, axis=0).reshape(x_cat.shape[0], -1)
    x = jnp.concatenate([x_num, emb], axis=-1)
    for w, b in zip(model.weights, model.biases):
        y = x @ w + b
        x = _SELU_SCALE * jnp.where(y > 0, y, _SELU_ALPHA * (jnp.exp(y) - 1.0))
    y = x @ model.head_w + model.head_b
    return y[:, 0]


if __name__ == "__main__":
    key = jax.random.PRNGKey(0)
    k_model, k_num, k_cat = jax.random.split(key, 3)

    batch = 8
    d_num = 16
    categories = [3, 5, 7]
    d_embedding = 8
    d_layers = [32, 32]
    d_out = 1

    model = SNNPallas(d_in=d_num, d_layers=d_layers, dropout=0.1, d_out=d_out,
                      categories=categories, d_embedding=d_embedding, key=k_model)

    x_num = jax.random.normal(k_num, (batch, d_num), jnp.float32)
    x_cat = jnp.stack(
        [jax.random.randint(jax.random.fold_in(k_cat, i), (batch,), 0, c)
         for i, c in enumerate(categories)], axis=1).astype(jnp.int32)

    out = model(x_num, x_cat)
    out = jax.block_until_ready(out)

    ref = _reference(model, x_num, x_cat)
    assert out.shape == (batch,)
    # bf16 matmul operands (f32 accumulation) -> relaxed tolerance vs f32 reference.
    assert jnp.allclose(out, ref, atol=5e-2, rtol=5e-2), (out, ref)

    print("KERNEL_OK")
</pallas_src>

<mosaic_0001>
module attributes {stable_mosaic.version = 11 : i64} {
  func.func @_snn_fused_kernel(%arg0: i32, %arg1: memref<8x128xbf16, #tpu.memory_space<vmem>>, %arg2: memref<128x128xbf16, #tpu.memory_space<vmem>>, %arg3: memref<1x128xf32, #tpu.memory_space<vmem>>, %arg4: memref<128x128xbf16, #tpu.memory_space<vmem>>, %arg5: memref<1x128xf32, #tpu.memory_space<vmem>>, %arg6: memref<128x128xbf16, #tpu.memory_space<vmem>>, %arg7: memref<1x128xf32, #tpu.memory_space<vmem>>, %arg8: memref<8x128xf32, #tpu.memory_space<vmem>>) attributes {dimension_semantics = [#tpu.dimension_semantics<parallel>], iteration_bounds = array<i64: 1>, scalar_prefetch = 0 : i64, scratch_operands = 0 : i64, tpu.core_type = #tpu.core_type<tc>, window_params = [{transform_indices = @transform_0, window_bounds = array<i64: 8, 128>}, {pipeline_mode = #tpu.pipeline_mode<synchronous>, transform_indices = @transform_1, window_bounds = array<i64: 128, 128>}, {pipeline_mode = #tpu.pipeline_mode<synchronous>, transform_indices = @transform_2, window_bounds = array<i64: 1, 128>}, {pipeline_mode = #tpu.pipeline_mode<synchronous>, transform_indices = @transform_3, window_bounds = array<i64: 128, 128>}, {pipeline_mode = #tpu.pipeline_mode<synchronous>, transform_indices = @transform_4, window_bounds = array<i64: 1, 128>}, {pipeline_mode = #tpu.pipeline_mode<synchronous>, transform_indices = @transform_5, window_bounds = array<i64: 128, 128>}, {pipeline_mode = #tpu.pipeline_mode<synchronous>, transform_indices = @transform_6, window_bounds = array<i64: 1, 128>}, {transform_indices = @transform_7, window_bounds = array<i64: 8, 128>}]} {
    %c0 = arith.constant 0 : index
    %c0_0 = arith.constant 0 : index
    %0 = vector.load %arg1[%c0, %c0_0] : memref<8x128xbf16, #tpu.memory_space<vmem>>, vector<8x128xbf16>
    %c0_1 = arith.constant 0 : index
    %c0_2 = arith.constant 0 : index
    %1 = vector.load %arg2[%c0_1, %c0_2] : memref<128x128xbf16, #tpu.memory_space<vmem>>, vector<128x128xbf16>
    %c0_3 = arith.constant 0 : index
    %c0_4 = arith.constant 0 : index
    %2 = vector.load %arg3[%c0_3, %c0_4] : memref<1x128xf32, #tpu.memory_space<vmem>>, vector<1x128xf32>
    %cst = arith.constant dense<0.000000e+00> : vector<8x128xf32>
    %3 = tpu.matmul %0, %1, %cst {dimension_numbers = #tpu.dot_dimension_numbers<[1], [0], [0], [1], [0, 0, 1, 1], [], []>} : vector<8x128xbf16>, vector<128x128xbf16>, vector<8x128xf32> -> vector<8x128xf32>
    %4 = vector.broadcast %2 : vector<1x128xf32> to vector<8x128xf32>
    %5 = arith.addf %3, %4 : vector<8x128xf32>
    %cst_5 = arith.constant 0.000000e+00 : f32
    %6 = vector.broadcast %cst_5 : f32 to vector<8x128xf32>
    %7 = arith.cmpf ogt, %5, %6 : vector<8x128xf32>
    %8 = math.exp %5 : vector<8x128xf32>
    %cst_6 = arith.constant 1.000000e+00 : f32
    %9 = vector.broadcast %cst_6 : f32 to vector<8x128xf32>
    %10 = arith.subf %8, %9 : vector<8x128xf32>
    %cst_7 = arith.constant 1.67326319 : f32
    %11 = vector.broadcast %cst_7 : f32 to vector<8x128xf32>
    %12 = arith.mulf %11, %10 : vector<8x128xf32>
    %13 = arith.select %7, %5, %12 : vector<8x128xi1>, vector<8x128xf32>
    %cst_8 = arith.constant 1.05070102 : f32
    %14 = vector.broadcast %cst_8 : f32 to vector<8x128xf32>
    %15 = arith.mulf %14, %13 : vector<8x128xf32>
    %16 = arith.truncf %15 : vector<8x128xf32> to vector<8x128xbf16>
    %c0_9 = arith.constant 0 : index
    %c0_10 = arith.constant 0 : index
    %17 = vector.load %arg4[%c0_9, %c0_10] : memref<128x128xbf16, #tpu.memory_space<vmem>>, vector<128x128xbf16>
    %c0_11 = arith.constant 0 : index
    %c0_12 = arith.constant 0 : index
    %18 = vector.load %arg5[%c0_11, %c0_12] : memref<1x128xf32, #tpu.memory_space<vmem>>, vector<1x128xf32>
    %cst_13 = arith.constant dense<0.000000e+00> : vector<8x128xf32>
    %19 = tpu.matmul %16, %17, %cst_13 {dimension_numbers = #tpu.dot_dimension_numbers<[1], [0], [0], [1], [0, 0, 1, 1], [], []>} : vector<8x128xbf16>, vector<128x128xbf16>, vector<8x128xf32> -> vector<8x128xf32>
    %20 = vector.broadcast %18 : vector<1x128xf32> to vector<8x128xf32>
    %21 = arith.addf %19, %20 : vector<8x128xf32>
    %cst_14 = arith.constant 0.000000e+00 : f32
    %22 = vector.broadcast %cst_14 : f32 to vector<8x128xf32>
    %23 = arith.cmpf ogt, %21, %22 : vector<8x128xf32>
    %24 = math.exp %21 : vector<8x128xf32>
    %cst_15 = arith.constant 1.000000e+00 : f32
    %25 = vector.broadcast %cst_15 : f32 to vector<8x128xf32>
    %26 = arith.subf %24, %25 : vector<8x128xf32>
    %cst_16 = arith.constant 1.67326319 : f32
    %27 = vector.broadcast %cst_16 : f32 to vector<8x128xf32>
    %28 = arith.mulf %27, %26 : vector<8x128xf32>
    %29 = arith.select %23, %21, %28 : vector<8x128xi1>, vector<8x128xf32>
    %cst_17 = arith.constant 1.05070102 : f32
    %30 = vector.broadcast %cst_17 : f32 to vector<8x128xf32>
    %31 = arith.mulf %30, %29 : vector<8x128xf32>
    %32 = arith.truncf %31 : vector<8x128xf32> to vector<8x128xbf16>
    %c0_18 = arith.constant 0 : index
    %c0_19 = arith.constant 0 : index
    %33 = vector.load %arg6[%c0_18, %c0_19] : memref<128x128xbf16, #tpu.memory_space<vmem>>, vector<128x128xbf16>
    %c0_20 = arith.constant 0 : index
    %c0_21 = arith.constant 0 : index
    %34 = vector.load %arg7[%c0_20, %c0_21] : memref<1x128xf32, #tpu.memory_space<vmem>>, vector<1x128xf32>
    %cst_22 = arith.constant dense<0.000000e+00> : vector<8x128xf32>
    %35 = tpu.matmul %32, %33, %cst_22 {dimension_numbers = #tpu.dot_dimension_numbers<[1], [0], [0], [1], [0, 0, 1, 1], [], []>} : vector<8x128xbf16>, vector<128x128xbf16>, vector<8x128xf32> -> vector<8x128xf32>
    %36 = vector.broadcast %34 : vector<1x128xf32> to vector<8x128xf32>
    %37 = arith.addf %35, %36 : vector<8x128xf32>
    %c0_23 = arith.constant 0 : index
    %c0_24 = arith.constant 0 : index
    %38 = vector.load %arg8[%c0_23, %c0_24] : memref<8x128xf32, #tpu.memory_space<vmem>>, vector<8x128xf32>
    tpu.vector_store %arg8[%c0_23, %c0_24], %37 {strides = array<i32>} : memref<8x128xf32, #tpu.memory_space<vmem>>, vector<8x128xf32>,
    return
  }
  func.func @transform_0(%arg0: i32) -> (i32, i32) {
    %c0_i32 = arith.constant 0 : i32
    %c0_i32_0 = arith.constant 0 : i32
    return %arg0, %c0_i32 : i32, i32
  }
  func.func @transform_1(%arg0: i32) -> (i32, i32) {
    %c0_i32 = arith.constant 0 : i32
    %c0_i32_0 = arith.constant 0 : i32
    %c0_i32_1 = arith.constant 0 : i32
    return %c0_i32, %c0_i32_0 : i32, i32
  }
  func.func @transform_2(%arg0: i32) -> (i32, i32) {
    %c0_i32 = arith.constant 0 : i32
    %c0_i32_0 = arith.constant 0 : i32
    %c0_i32_1 = arith.constant 0 : i32
    return %c0_i32, %c0_i32_0 : i32, i32
  }
  func.func @transform_3(%arg0: i32) -> (i32, i32) {
    %c0_i32 = arith.constant 0 : i32
    %c0_i32_0 = arith.constant 0 : i32
    %c0_i32_1 = arith.constant 0 : i32
    return %c0_i32, %c0_i32_0 : i32, i32
  }
  func.func @transform_4(%arg0: i32) -> (i32, i32) {
    %c0_i32 = arith.constant 0 : i32
    %c0_i32_0 = arith.constant 0 : i32
    %c0_i32_1 = arith.constant 0 : i32
    return %c0_i32, %c0_i32_0 : i32, i32
  }
  func.func @transform_5(%arg0: i32) -> (i32, i32) {
    %c0_i32 = arith.constant 0 : i32
    %c0_i32_0 = arith.constant 0 : i32
    %c0_i32_1 = arith.constant 0 : i32
    return %c0_i32, %c0_i32_0 : i32, i32
  }
  func.func @transform_6(%arg0: i32) -> (i32, i32) {
    %c0_i32 = arith.constant 0 : i32
    %c0_i32_0 = arith.constant 0 : i32
    %c0_i32_1 = arith.constant 0 : i32
    return %c0_i32, %c0_i32_0 : i32, i32
  }
  func.func @transform_7(%arg0: i32) -> (i32, i32) {
    %c0_i32 = arith.constant 0 : i32
    %c0_i32_0 = arith.constant 0 : i32
    return %arg0, %c0_i32 : i32, i32
  }
}

</mosaic_0001>

<bundles_post_ra>
// kernel: _forward.1
= control target key start
LH: loop header
LB: loop body
LE: loop exit
PB: predicated region body
PF: predicated region fallthrough
CT: control target
= control target key end

     0   :  { %v528_v0 = vmov 0.0   ;;  %vm529_vm0 = vmmov 0   ;;  %s687_s1 = inlined_call_operand.vmem [shape: bf16[128,128], index: 1, kind: input, shape index: {}]   ;;  %s688_s3 = inlined_call_operand.vmem [shape: bf16[128,128], index: 3, kind: input, shape index: {}]   ;;  %s689_s0 = inlined_call_operand.vmem [shape: bf16[8,128], index: 0, kind: input, shape index: {}]   ;;  %s690_s5 = inlined_call_operand.vmem [shape: bf16[128,128], index: 5, kind: input, shape index: {}]   ;;  %s691_s2 = inlined_call_operand.vmem [shape: f32[1,128], index: 2, kind: input, shape index: {}, may-alias: {2,4,6}]   ;;  %s692_s4 = inlined_call_operand.vmem [shape: f32[1,128], index: 4, kind: input, shape index: {}, may-alias: {2,4,6}]   ;;  %s693_s6 = inlined_call_operand.vmem [shape: f32[1,128], index: 6, kind: input, shape index: {}, may-alias: {2,4,6}]   ;;  %s694_s7 = inlined_call_operand.vmem [shape: f32[8,128], index: 7, kind: output, shape index: {}]  }
   0x1   :  { %438 = vmatprep.subr.bf16.mxu0 %v528_v0  ;;  %v500_v1 = vld [vmem:[%s687_s1] sm:$0xff]   ;;  %454 = vmatprep.mubr.msk.bf16.mxu0 %vm529_vm0, %v528_v0  ;;  %v501_v2 = vld [vmem:[%s687_s1 + $0x8] sm:$0xff]   ;;  %v502_v3 = vld [vmem:[%s687_s1 + $0x10] sm:$0xff]  }
   0x2   :  { %458 = vmatprep.subr.bf16.mxu1 %v528_v0  ;;  %474 = vmatprep.mubr.msk.bf16.mxu1 %vm529_vm0, %v528_v0  ;;  %v508_v4 = vld [vmem:[%s688_s3] sm:$0xff]   ;;  %v503_v5 = vld [vmem:[%s687_s1 + $0x18] sm:$0xff]   ;;  %v509_v6 = vld [vmem:[%s688_s3 + $0x8] sm:$0xff]  }
   0x3   :  { %439 = vmatpush3.bf16.msra.mxu0 %v500_v1  ;;  %459 = vmatpush3.bf16.msra.mxu1 %v508_v4  ;;  %v504_v7 = vld [vmem:[%s687_s1 + $0x20] sm:$0xff]   ;;  %v505_v8 = vld [vmem:[%s687_s1 + $0x28] sm:$0xff]   ;;  %v506_v9 = vld [vmem:[%s687_s1 + $0x30] sm:$0xff]  }
   0x4   :  { %440 = vmatprep.subr.bf16.mxu0 %v528_v0  ;;  %460 = vmatprep.subr.bf16.mxu1 %v528_v0  ;;  %v507_v10 = vld [vmem:[%s687_s1 + $0x38] sm:$0xff]   ;;  %v27_v11 = vld [vmem:[%s689_s0] sm:$0xf]  ;;  %v510_v12 = vld [vmem:[%s688_s3 + $0x10] sm:$0xff]  }
   0x5   :  { %v511_v13 = vld [vmem:[%s688_s3 + $0x18] sm:$0xff]   ;;  %v512_v14 = vld [vmem:[%s688_s3 + $0x20] sm:$0xff]   ;;  %v513_v15 = vld [vmem:[%s688_s3 + $0x28] sm:$0xff]  }
   0x6   :  { %v514_v16 = vld [vmem:[%s688_s3 + $0x30] sm:$0xff]   ;;  %v515_v17 = vld [vmem:[%s688_s3 + $0x38] sm:$0xff]   ;;  %v516_v18 = vld [vmem:[%s690_s5] sm:$0xff]  }
   0x7   :  { %441 = vmatpush3.bf16.msra.mxu0 %v501_v2  ;;  %461 = vmatpush3.bf16.msra.mxu1 %v509_v6  ;;  %v517_v19 = vld [vmem:[%s690_s5 + $0x8] sm:$0xff]   ;;  %v382_v20 = vld [vmem:[%s691_s2] ss:$0 sm:$0xff]  ;;  %v518_v33 = vld [vmem:[%s690_s5 + $0x10] sm:$0xff]  }
   0x8   :  { %442 = vmatprep.subr.bf16.mxu0 %v528_v0  ;;  %462 = vmatprep.subr.bf16.mxu1 %v528_v0  ;;  %v519_v34 = vld [vmem:[%s690_s5 + $0x18] sm:$0xff]   ;;  %v520_v35 = vld [vmem:[%s690_s5 + $0x20] sm:$0xff]   ;;  %v521_v36 = vld [vmem:[%s690_s5 + $0x28] sm:$0xff]  }
   0x9   :  { %v522_v37 = vld [vmem:[%s690_s5 + $0x30] sm:$0xff]   ;;  %v523_v38 = vld [vmem:[%s690_s5 + $0x38] sm:$0xff]   ;;  %v392_v39 = vld [vmem:[%s692_s4] ss:$0 sm:$0xff] }
   0xa   :  { %v402_v52 = vld [vmem:[%s693_s6] ss:$0 sm:$0xff] }
   0xb   :  { %443 = vmatpush3.bf16.msra.mxu0 %v502_v3  ;;  %463 = vmatpush3.bf16.msra.mxu1 %v510_v12 }
   0xc   :  { %444 = vmatprep.subr.bf16.mxu0 %v528_v0  ;;  %464 = vmatprep.subr.bf16.mxu1 %v528_v0 }
   0xf   :  { %445 = vmatpush3.bf16.msra.mxu0 %v503_v5  ;;  %465 = vmatpush3.bf16.msra.mxu1 %v511_v13 }
  0x10   :  { %446 = vmatprep.subr.bf16.mxu0 %v528_v0  ;;  %466 = vmatprep.subr.bf16.mxu1 %v528_v0 }
  0x13   :  { %447 = vmatpush3.bf16.msra.mxu0 %v504_v7  ;;  %467 = vmatpush3.bf16.msra.mxu1 %v512_v14 }
  0x14   :  { %448 = vmatprep.subr.bf16.mxu0 %v528_v0  ;;  %468 = vmatprep.subr.bf16.mxu1 %v528_v0 }
  0x17   :  { %449 = vmatpush3.bf16.msra.mxu0 %v505_v8  ;;  %469 = vmatpush3.bf16.msra.mxu1 %v513_v15 }
  0x18   :  { %450 = vmatprep.subr.bf16.mxu0 %v528_v0  ;;  %470 = vmatprep.subr.bf16.mxu1 %v528_v0 }
  0x1b   :  { %451 = vmatpush3.bf16.msra.mxu0 %v506_v9  ;;  %471 = vmatpush3.bf16.msra.mxu1 %v514_v16 }
  0x1c   :  { %452 = vmatprep.subr.bf16.mxu0 %v528_v0  ;;  %472 = vmatprep.subr.bf16.mxu1 %v528_v0 }
  0x1f   :  { %453 = vmatpush3.bf16.msra.mxu0 %v507_v10  ;;  %473 = vmatpush3.bf16.msra.mxu1 %v515_v17 }
  0x20   :  { %478 = vmatprep.subr.bf16.mxu0 %v528_v0 }
  0x22   :  { %455 = vmatmul.mubr.bf16.vlgmr.msra.gmra.mrb[0].mxu0 %v27_v11 }
  0x23   :  { %494 = vmatprep.mubr.msk.bf16.mxu0 %vm529_vm0, %v528_v0  ;;  %479 = vmatpush3.bf16.msra.mxu0 %v516_v18 }
  0x24   :  { %480 = vmatprep.subr.bf16.mxu0 %v528_v0 }
  0x27   :  { %481 = vmatpush3.bf16.msra.mxu0 %v517_v19 }
  0x28   :  { %482 = vmatprep.subr.bf16.mxu0 %v528_v0 }
  0x2b   :  { %483 = vmatpush3.bf16.msra.mxu0 %v518_v33 }
  0x2c   :  { %484 = vmatprep.subr.bf16.mxu0 %v528_v0 }
  0x2f   :  { %485 = vmatpush3.bf16.msra.mxu0 %v519_v34 }
  0x30   :  { %486 = vmatprep.subr.bf16.mxu0 %v528_v0 }
  0x33   :  { %487 = vmatpush3.bf16.msra.mxu0 %v520_v35 }
  0x34   :  { %488 = vmatprep.subr.bf16.mxu0 %v528_v0 }
  0x37   :  { %489 = vmatpush3.bf16.msra.mxu0 %v521_v36 }
  0x38   :  { %490 = vmatprep.subr.bf16.mxu0 %v528_v0 }
  0x3b   :  { %491 = vmatpush3.bf16.msra.mxu0 %v522_v37 }
  0x3c   :  { %492 = vmatprep.subr.bf16.mxu0 %v528_v0 }
  0x3f   :  { %493 = vmatpush3.bf16.msra.mxu0 %v523_v38 }
  0xf5   :  { %v133_v21 = vpop.f32.mrb[0].mxu0 }
  0xf6   :  { %v134_v22 = vadd.f32 %v382_v20, %v133_v21  ;;  %v456_v23 = vpop.f32.mrb[1].mxu0 }
  0xf7   :  { %v136_v24 = vpop.f32.mrb[2].mxu0 }
  0xf8   :  { %v140_v25 = vmul.f32 1.442695, %v134_v22  ;;  %v457_v26 = vpop.f32.mrb[3].mxu0  ;;  %vm139_vm1 = vcmp.gt.f32.partialorder %v134_v22, 0.0 }
  0xfa   :  { %524 = vpow2.f32 %v140_v25 }
 0x104   :  { %v525_v27 = vpop.eup %524 }
 0x105   :  { %v391_v28 = vadd.f32 -1.0, %v525_v27 }
 0x107   :  { %v143_v29 = vmul.f32 1.6732632, %v391_v28 }
 0x109   :  { %v144_v30 = vsel %vm139_vm1, %v134_v22, %v143_v29 }
 0x10a   :  { %v145_v31 = vmul.f32 1.050701, %v144_v30 }
 0x10c   :  { %v146_v32 = vpack.c.bf16 %v145_v31, %v145_v31 }
 0x10e   :  { %475 = vmatmul.mubr.bf16.vlgmr.msra.gmra.mrb[0].mxu1 %v146_v32 }
 0x1e1   :  { %v252_v40 = vpop.f32.mrb[0].mxu1 }
 0x1e2   :  { %v253_v41 = vadd.f32 %v392_v39, %v252_v40  ;;  %v476_v42 = vpop.f32.mrb[1].mxu1 }
 0x1e3   :  { %v255_v43 = vpop.f32.mrb[2].mxu1 }
 0x1e4   :  { %v259_v44 = vmul.f32 1.442695, %v253_v41  ;;  %v477_v45 = vpop.f32.mrb[3].mxu1  ;;  %vm258_vm2 = vcmp.gt.f32.partialorder %v253_v41, 0.0 }
 0x1e6   :  { %526 = vpow2.f32 %v259_v44 }
 0x1f0   :  { %v527_v46 = vpop.eup %526 }
 0x1f1   :  { %v401_v47 = vadd.f32 -1.0, %v527_v46 }
 0x1f3   :  { %v262_v48 = vmul.f32 1.6732632, %v401_v47 }
 0x1f5   :  { %v263_v49 = vsel %vm258_vm2, %v253_v41, %v262_v48 }
 0x1f6   :  { %v264_v50 = vmul.f32 1.050701, %v263_v49 }
 0x1f8   :  { %v265_v51 = vpack.c.bf16 %v264_v50, %v264_v50 }
 0x1fa   :  { %495 = vmatmul.mubr.bf16.vlgmr.msra.gmra.mrb[4].mxu0 %v265_v51 }
 0x2cd   :  { %v371_v53 = vpop.f32.mrb[4].mxu0 }
 0x2ce   :  { %v372_v54 = vadd.f32 %v402_v52, %v371_v53  ;;  %v496_v55 = vpop.f32.mrb[5].mxu0 }
 0x2cf   :  { %v374_v56 = vpop.f32.mrb[6].mxu0 }
 0x2d0   :  { %377 = vst [vmem:[%s694_s7] sm:$0xff] %v372_v54  ;;  %v497_v57 = vpop.f32.mrb[7].mxu0 }

</bundles_post_ra>
